<compile_context>
chip_gen: v5e
topology: v5e:2x2
jax: 0.10.0
libtpu: 0.0.40
codegen_flags: <defaults>
</compile_context>

<pallas_src>
import functools

import jax
import jax.numpy as jnp
from jax import lax
from jax.experimental import pallas as pl
from jax.experimental.pallas import tpu as pltpu

_LANE = 128
_SUB = 8
_SLAB = 512          # rows per inner slab (multiple of 32 -> legal for int8/bool)
_R_TILE_CAP = 8192   # rows per grid step: 8192*128*4B = 4 MiB f32 per input block


def _focal_dice_kernel(p_ref, t_ref, acc_ref, *, r_tile, slab, rows_valid,
                       n_chunks, gamma, binary_targets, needs_mask):
    """Grid = (sample, row_chunk).

    acc_ref is the per-sample output block (1, 4, 8, 128) holding partial sums
    of [focal/alpha, p*t, p, t]; it stays VMEM-resident across the reduction.
    """
    r = pl.program_id(1)

    @pl.when(r == 0)
    def _():
        acc_ref[...] = jnp.zeros_like(acc_ref)

    n_slabs = r_tile // slab

    def vreg_sum(x):
        # (slab, 128) -> (8, 128): sublane-group adds only (pure VALU, no XLU
        # work in the hot loop).
        return x.reshape(slab // _SUB, _SUB, _LANE).sum(axis=0)

    def slab_terms(row0, masked):
        p = p_ref[0, pl.ds(row0, slab), :].astype(jnp.float32)
        t = t_ref[0, pl.ds(row0, slab), :].astype(jnp.float32)
        if masked:
            # Rows past the true row count (partial last block: Pallas does NOT
            # guarantee zero fill) are forced to the neutral (p=0, t=0) point
            # *before* any math, matching PyTorch's clamp-before-multiply order.
            g_row = (r * r_tile + row0
                     + lax.broadcasted_iota(jnp.int32, (slab, _LANE), 0))
            valid = g_row < rows_valid
            p = jnp.where(valid, p, 0.0)
            t = jnp.where(valid, t, 0.0)

        if binary_targets:
            # Hard {0,1} masks: pt = p (t=1) or 1-p (t=0); one log instead of
            # two logs + an exp. Opt-in only (changes results for soft labels).
            pt = jnp.where(t >= 0.5, p, 1.0 - p)
            bce = -jnp.maximum(jnp.log(pt), -100.0)
        else:
            # Exact binary_cross_entropy(reduction='none'); PyTorch clamps the
            # log terms at -100 before the blend.
            log_p = jnp.maximum(jnp.log(p), -100.0)
            log_1mp = jnp.maximum(jnp.log(1.0 - p), -100.0)
            bce = -(log_1mp + t * (log_p - log_1mp))
            pt = jnp.exp(-bce)

        one_m_pt = 1.0 - pt
        mod = one_m_pt * one_m_pt if gamma == 2.0 else one_m_pt ** gamma
        focal = mod * bce                      # alpha folded into the epilogue
        return focal, p * t, p, t

    def accumulate(masked):
        def add_terms(row0, carry):
            f_a, i_a, p_a, t_a = carry
            focal, inter, psum, tsum = slab_terms(row0, masked)
            return (f_a + vreg_sum(focal), i_a + vreg_sum(inter),
                    p_a + vreg_sum(psum), t_a + vreg_sum(tsum))

        zero = jnp.zeros((_SUB, _LANE), jnp.float32)
        init = (zero, zero, zero, zero)
        if n_slabs == 1:
            f_a, i_a, p_a, t_a = add_terms(0, init)
        else:
            def body(i, carry):
                return add_terms(pl.multiple_of(i * slab, slab), carry)
            f_a, i_a, p_a, t_a = lax.fori_loop(0, n_slabs, body, init)

        # Four direct lane-dense (8,128) vreg RMWs on the resident accumulator.
        acc_ref[0, 0] += f_a
        acc_ref[0, 1] += i_a
        acc_ref[0, 2] += p_a
        acc_ref[0, 3] += t_a

    if needs_mask and n_chunks > 1:
        last = n_chunks - 1

        @pl.when(r == last)
        def _():
            accumulate(True)

        @pl.when(r != last)
        def _():
            accumulate(False)
    elif needs_mask:
        accumulate(True)
    else:
        accumulate(False)


def focal_dice_loss(inputs, targets, alpha=0.25, gamma=2.0, smooth=1e-6,
                    binary_targets=False):
    """Pallas implementation of FocalDiceLoss.forward. Returns a scalar f32."""
    assert inputs.shape == targets.shape
    B = inputs.shape[0]
    p2 = inputs.reshape(B, -1)       # contiguous reshape: no HBM traffic
    t2 = targets.reshape(B, -1)      # targets kept in their original dtype
    D = p2.shape[1]
    total_elems = B * D              # focal mean uses the *unpadded* count

    R = pl.cdiv(D, _LANE)
    # Packed-sublane dtypes (bf16/int8/bool) need row tiles that are multiples
    # of 32 unless the tile equals the full row extent.
    narrow = min(jnp.dtype(inputs.dtype).itemsize,
                 jnp.dtype(targets.dtype).itemsize) < 4
    gran = 32 if narrow else _SUB

    if R <= _SLAB:
        # Tiny sample: single chunk, single slab.  Round rows up to the sublane
        # granularity (<= 256 KiB/sample pad -> negligible copy).
        r_rows = pl.cdiv(R, gran) * gran
        r_tile, slab, n_chunks = r_rows, r_rows, 1
        needs_mask = False
        R_arr = r_rows
    else:
        # Large sample: big chunks, ragged last chunk masked in-kernel instead
        # of materialising a row-padded copy of the tensors in HBM.
        r_tile = min((R // _SLAB) * _SLAB, _R_TILE_CAP)
        slab = _SLAB
        n_chunks = pl.cdiv(R, r_tile)
        needs_mask = (R % r_tile) != 0
        R_arr = R

    pad = R_arr * _LANE - D
    if pad:
        # TODO(synk): when C*H*W is not a multiple of 128 this lane-tail pad
        # still copies the tensors once through HBM; removing it needs
        # element-level masking over a manually-DMA'd flat layout.
        p2 = jnp.pad(p2, ((0, 0), (0, pad)))
        t2 = jnp.pad(t2, ((0, 0), (0, pad)))
    p3 = p2.reshape(B, R_arr, _LANE)
    t3 = t2.reshape(B, R_arr, _LANE)

    kernel = functools.partial(
        _focal_dice_kernel,
        r_tile=r_tile, slab=slab, rows_valid=R_arr, n_chunks=n_chunks,
        gamma=float(gamma), binary_targets=bool(binary_targets),
        needs_mask=needs_mask)

    in_bytes = p3.size * p3.dtype.itemsize + t3.size * t3.dtype.itemsize
    cost = pl.CostEstimate(
        flops=18 * total_elems,
        transcendentals=(1 if binary_targets else 3) * total_elems,
        bytes_accessed=in_bytes + B * 4 * _SUB * _LANE * 4)

    partials = pl.pallas_call(
        kernel,
        out_shape=jax.ShapeDtypeStruct((B, 4, _SUB, _LANE), jnp.float32),
        grid_spec=pltpu.PrefetchScalarGridSpec(
            num_scalar_prefetch=0,
            grid=(B, n_chunks),
            in_specs=[
                pl.BlockSpec((1, r_tile, _LANE), lambda b, r: (b, r, 0)),
                pl.BlockSpec((1, r_tile, _LANE), lambda b, r: (b, r, 0)),
            ],
            out_specs=pl.BlockSpec((1, 4, _SUB, _LANE),
                                   lambda b, r: (b, 0, 0, 0)),
        ),
        compiler_params=pltpu.CompilerParams(
            dimension_semantics=("parallel", "arbitrary"),
            vmem_limit_bytes=48 * 1024 * 1024,
        ),
        cost_estimate=cost,
    )(p3, t3)

    # Tiny epilogue on (B, 4, 8, 128) partials; alpha applied here (folded out
    # of the hot loop).
    sums = jnp.sum(partials, axis=(2, 3))                    # (B, 4)
    focal_loss = float(alpha) * jnp.sum(sums[:, 0]) / float(total_elems)
    intersection = sums[:, 1]
    dice = (2.0 * intersection + smooth) / (sums[:, 2] + sums[:, 3] + smooth)
    dice_loss = 1.0 - jnp.mean(dice)
    return 0.5 * focal_loss + 0.5 * dice_loss


def focal_dice_loss_ref(inputs, targets, alpha=0.25, gamma=2.0, smooth=1e-6):
    """Pure-JAX reference mirroring the PyTorch module."""
    p = inputs.astype(jnp.float32)
    t = targets.astype(jnp.float32)
    bce = -(t * jnp.maximum(jnp.log(p), -100.0)
            + (1.0 - t) * jnp.maximum(jnp.log(1.0 - p), -100.0))
    pt = jnp.exp(-bce)
    focal_loss = jnp.mean(alpha * (1.0 - pt) ** gamma * bce)
    B = p.shape[0]
    pf = p.reshape(B, -1)
    tf = t.reshape(B, -1)
    inter = jnp.sum(pf * tf, axis=1)
    dice = (2.0 * inter + smooth) / (jnp.sum(pf, axis=1) + jnp.sum(tf, axis=1) + smooth)
    dice_loss = 1.0 - jnp.mean(dice)
    return 0.5 * focal_loss + 0.5 * dice_loss


if __name__ == "__main__":
    # FocalDiceLoss has no learnable parameters; alpha/gamma/smooth are the
    # deterministic constructor constants (0.25, 2.0, 1e-6).
    key = jax.random.PRNGKey(0)
    k_in, k_tg, k_in2, k_tg2 = jax.random.split(key, 4)

    # Small segmentation-style batch: inputs are probabilities (post-sigmoid),
    # targets are binary masks.
    B, C, H, W = 2, 4, 32, 32
    inputs = jax.random.uniform(k_in, (B, C, H, W), jnp.float32,
                                minval=1e-4, maxval=1.0 - 1e-4)
    targets = (jax.random.uniform(k_tg, (B, C, H, W)) > 0.5).astype(jnp.float32)

    ref = jax.block_until_ready(focal_dice_loss_ref(inputs, targets))

    # Exact (soft-label-safe) path.
    loss = jax.block_until_ready(focal_dice_loss(inputs, targets))
    assert jnp.allclose(loss, ref, rtol=1e-5, atol=1e-6), (loss, ref)

    # Narrow-dtype targets + single-log binary fast path (exact for {0,1} masks,
    # and ~37% less HBM traffic from streaming int8 targets).
    loss_bin = jax.block_until_ready(
        focal_dice_loss(inputs, targets.astype(jnp.int8), binary_targets=True))
    assert jnp.allclose(loss_bin, ref, rtol=1e-5, atol=1e-6), (loss_bin, ref)

    # Larger, non-chunk-aligned shape: exercises multi-chunk streaming, the
    # in-kernel masked ragged tail (no jnp.pad round trip) and the slab loop.
    B2, C2, H2, W2 = 2, 8, 136, 128     # D = 139264 -> 1088 rows = 1024 + 64
    inputs2 = jax.random.uniform(k_in2, (B2, C2, H2, W2), jnp.float32,
                                 minval=1e-4, maxval=1.0 - 1e-4)
    targets2 = (jax.random.uniform(k_tg2, (B2, C2, H2, W2)) > 0.5).astype(jnp.float32)
    ref2 = jax.block_until_ready(focal_dice_loss_ref(inputs2, targets2))
    loss2 = jax.block_until_ready(focal_dice_loss(inputs2, targets2))
    assert jnp.allclose(loss2, ref2, rtol=1e-5, atol=1e-6), (loss2, ref2)

    print("KERNEL_OK")
</pallas_src>

<mosaic_0001>
module attributes {stable_mosaic.version = 11 : i64} {
  func.func @_focal_dice_kernel(%arg0: i32, %arg1: i32, %arg2: memref<1x32x128xf32, #tpu.memory_space<vmem>>, %arg3: memref<1x32x128xf32, #tpu.memory_space<vmem>>, %arg4: memref<1x4x8x128xf32, #tpu.memory_space<vmem>>) attributes {dimension_semantics = [#tpu.dimension_semantics<parallel>, #tpu.dimension_semantics<arbitrary>], iteration_bounds = array<i64: 2, 1>, scalar_prefetch = 0 : i64, scratch_operands = 0 : i64, tpu.core_type = #tpu.core_type<tc>, window_params = [{transform_indices = @transform_0, window_bounds = array<i64: 1, 32, 128>}, {transform_indices = @transform_1, window_bounds = array<i64: 1, 32, 128>}, {transform_indices = @transform_2, window_bounds = array<i64: 1, 4, 8, 128>}]} {
    %c0_i32 = arith.constant 0 : i32
    %0 = arith.cmpi eq, %arg1, %c0_i32 : i32
    %1 = arith.extui %0 : i1 to i32
    %c0_i32_0 = arith.constant 0 : i32
    %2 = arith.cmpi ne, %1, %c0_i32_0 : i32
    scf.if %2 {
      %cst_45 = arith.constant 0.000000e+00 : f32
      %65 = vector.broadcast %cst_45 : f32 to vector<1x4x8x128xf32>
      %c0_46 = arith.constant 0 : index
      %c0_47 = arith.constant 0 : index
      %c0_48 = arith.constant 0 : index
      %c0_49 = arith.constant 0 : index
      %66 = vector.load %arg4[%c0_46, %c0_47, %c0_48, %c0_49] : memref<1x4x8x128xf32, #tpu.memory_space<vmem>>, vector<1x4x8x128xf32>
      tpu.vector_store %arg4[%c0_46, %c0_47, %c0_48, %c0_49], %65 {strides = array<i32>} : memref<1x4x8x128xf32, #tpu.memory_space<vmem>>, vector<1x4x8x128xf32>,
    } else {
    }
    %cst = arith.constant 0.000000e+00 : f32
    %3 = vector.broadcast %cst : f32 to vector<8x128xf32>
    %c0 = arith.constant 0 : index
    %c0_1 = arith.constant 0 : index
    %c0_2 = arith.constant 0 : index
    %4 = vector.load %arg2[%c0, %c0_1, %c0_2] : memref<1x32x128xf32, #tpu.memory_space<vmem>>, vector<1x32x128xf32>
    %5 = vector.shape_cast %4 : vector<1x32x128xf32> to vector<32x128xf32>
    %c0_3 = arith.constant 0 : index
    %c0_4 = arith.constant 0 : index
    %c0_5 = arith.constant 0 : index
    %6 = vector.load %arg3[%c0_3, %c0_4, %c0_5] : memref<1x32x128xf32, #tpu.memory_space<vmem>>, vector<1x32x128xf32>
    %7 = vector.shape_cast %6 : vector<1x32x128xf32> to vector<32x128xf32>
    %8 = math.log %5 : vector<32x128xf32>
    %cst_6 = arith.constant -1.000000e+02 : f32
    %9 = vector.broadcast %cst_6 : f32 to vector<32x128xf32>
    %10 = arith.maximumf %8, %9 : vector<32x128xf32>
    %cst_7 = arith.constant 1.000000e+00 : f32
    %11 = vector.broadcast %cst_7 : f32 to vector<32x128xf32>
    %12 = arith.subf %11, %5 : vector<32x128xf32>
    %13 = math.log %12 : vector<32x128xf32>
    %cst_8 = arith.constant -1.000000e+02 : f32
    %14 = vector.broadcast %cst_8 : f32 to vector<32x128xf32>
    %15 = arith.maximumf %13, %14 : vector<32x128xf32>
    %16 = arith.subf %10, %15 : vector<32x128xf32>
    %17 = arith.mulf %7, %16 : vector<32x128xf32>
    %18 = arith.addf %15, %17 : vector<32x128xf32>
    %cst_9 = arith.constant 0.000000e+00 : f32
    %19 = vector.broadcast %cst_9 : f32 to vector<32x128xf32>
    %20 = arith.subf %19, %18 : vector<32x128xf32>
    %cst_10 = arith.constant 0.000000e+00 : f32
    %21 = vector.broadcast %cst_10 : f32 to vector<32x128xf32>
    %22 = arith.subf %21, %20 : vector<32x128xf32>
    %23 = math.exp %22 : vector<32x128xf32>
    %cst_11 = arith.constant 1.000000e+00 : f32
    %24 = vector.broadcast %cst_11 : f32 to vector<32x128xf32>
    %25 = arith.subf %24, %23 : vector<32x128xf32>
    %26 = arith.mulf %25, %25 : vector<32x128xf32>
    %27 = arith.mulf %26, %20 : vector<32x128xf32>
    %28 = arith.mulf %5, %7 : vector<32x128xf32>
    %29 = vector.shape_cast %27 : vector<32x128xf32> to vector<4x8x128xf32>
    %cst_12 = arith.constant dense<0.000000e+00> : vector<8x128xf32>
    %30 = vector.multi_reduction <add>, %29, %cst_12 [0] : vector<4x8x128xf32> to vector<8x128xf32>
    %31 = arith.addf %3, %30 : vector<8x128xf32>
    %32 = vector.shape_cast %28 : vector<32x128xf32> to vector<4x8x128xf32>
    %cst_13 = arith.constant dense<0.000000e+00> : vector<8x128xf32>
    %33 = vector.multi_reduction <add>, %32, %cst_13 [0] : vector<4x8x128xf32> to vector<8x128xf32>
    %34 = arith.addf %3, %33 : vector<8x128xf32>
    %35 = vector.shape_cast %5 : vector<32x128xf32> to vector<4x8x128xf32>
    %cst_14 = arith.constant dense<0.000000e+00> : vector<8x128xf32>
    %36 = vector.multi_reduction <add>, %35, %cst_14 [0] : vector<4x8x128xf32> to vector<8x128xf32>
    %37 = arith.addf %3, %36 : vector<8x128xf32>
    %38 = vector.shape_cast %7 : vector<32x128xf32> to vector<4x8x128xf32>
    %cst_15 = arith.constant dense<0.000000e+00> : vector<8x128xf32>
    %39 = vector.multi_reduction <add>, %38, %cst_15 [0] : vector<4x8x128xf32> to vector<8x128xf32>
    %40 = arith.addf %3, %39 : vector<8x128xf32>
    %c0_16 = arith.constant 0 : index
    %c0_17 = arith.constant 0 : index
    %c0_18 = arith.constant 0 : index
    %c0_19 = arith.constant 0 : index
    %41 = vector.load %arg4[%c0_16, %c0_17, %c0_18, %c0_19] : memref<1x4x8x128xf32, #tpu.memory_space<vmem>>, vector<1x1x8x128xf32>
    %42 = vector.shape_cast %41 : vector<1x1x8x128xf32> to vector<8x128xf32>
    %43 = arith.addf %42, %31 : vector<8x128xf32>
    %c0_20 = arith.constant 0 : index
    %c0_21 = arith.constant 0 : index
    %c0_22 = arith.constant 0 : index
    %c0_23 = arith.constant 0 : index
    %44 = vector.load %arg4[%c0_20, %c0_21, %c0_22, %c0_23] : memref<1x4x8x128xf32, #tpu.memory_space<vmem>>, vector<1x1x8x128xf32>
    %45 = vector.shape_cast %44 : vector<1x1x8x128xf32> to vector<8x128xf32>
    %46 = vector.shape_cast %43 : vector<8x128xf32> to vector<1x1x8x128xf32>
    tpu.vector_store %arg4[%c0_20, %c0_21, %c0_22, %c0_23], %46 {strides = array<i32>} : memref<1x4x8x128xf32, #tpu.memory_space<vmem>>, vector<1x1x8x128xf32>,
    %c0_24 = arith.constant 0 : index
    %c1 = arith.constant 1 : index
    %c0_25 = arith.constant 0 : index
    %c0_26 = arith.constant 0 : index
    %47 = vector.load %arg4[%c0_24, %c1, %c0_25, %c0_26] : memref<1x4x8x128xf32, #tpu.memory_space<vmem>>, vector<1x1x8x128xf32>
    %48 = vector.shape_cast %47 : vector<1x1x8x128xf32> to vector<8x128xf32>
    %49 = arith.addf %48, %34 : vector<8x128xf32>
    %c0_27 = arith.constant 0 : index
    %c1_28 = arith.constant 1 : index
    %c0_29 = arith.constant 0 : index
    %c0_30 = arith.constant 0 : index
    %50 = vector.load %arg4[%c0_27, %c1_28, %c0_29, %c0_30] : memref<1x4x8x128xf32, #tpu.memory_space<vmem>>, vector<1x1x8x128xf32>
    %51 = vector.shape_cast %50 : vector<1x1x8x128xf32> to vector<8x128xf32>
    %52 = vector.shape_cast %49 : vector<8x128xf32> to vector<1x1x8x128xf32>
    tpu.vector_store %arg4[%c0_27, %c1_28, %c0_29, %c0_30], %52 {strides = array<i32>} : memref<1x4x8x128xf32, #tpu.memory_space<vmem>>, vector<1x1x8x128xf32>,
    %c0_31 = arith.constant 0 : index
    %c2 = arith.constant 2 : index
    %c0_32 = arith.constant 0 : index
    %c0_33 = arith.constant 0 : index
    %53 = vector.load %arg4[%c0_31, %c2, %c0_32, %c0_33] : memref<1x4x8x128xf32, #tpu.memory_space<vmem>>, vector<1x1x8x128xf32>
    %54 = vector.shape_cast %53 : vector<1x1x8x128xf32> to vector<8x128xf32>
    %55 = arith.addf %54, %37 : vector<8x128xf32>
    %c0_34 = arith.constant 0 : index
    %c2_35 = arith.constant 2 : index
    %c0_36 = arith.constant 0 : index
    %c0_37 = arith.constant 0 : index
    %56 = vector.load %arg4[%c0_34, %c2_35, %c0_36, %c0_37] : memref<1x4x8x128xf32, #tpu.memory_space<vmem>>, vector<1x1x8x128xf32>
    %57 = vector.shape_cast %56 : vector<1x1x8x128xf32> to vector<8x128xf32>
    %58 = vector.shape_cast %55 : vector<8x128xf32> to vector<1x1x8x128xf32>
    tpu.vector_store %arg4[%c0_34, %c2_35, %c0_36, %c0_37], %58 {strides = array<i32>} : memref<1x4x8x128xf32, #tpu.memory_space<vmem>>, vector<1x1x8x128xf32>,
    %c0_38 = arith.constant 0 : index
    %c3 = arith.constant 3 : index
    %c0_39 = arith.constant 0 : index
    %c0_40 = arith.constant 0 : index
    %59 = vector.load %arg4[%c0_38, %c3, %c0_39, %c0_40] : memref<1x4x8x128xf32, #tpu.memory_space<vmem>>, vector<1x1x8x128xf32>
    %60 = vector.shape_cast %59 : vector<1x1x8x128xf32> to vector<8x128xf32>
    %61 = arith.addf %60, %40 : vector<8x128xf32>
    %c0_41 = arith.constant 0 : index
    %c3_42 = arith.constant 3 : index
    %c0_43 = arith.constant 0 : index
    %c0_44 = arith.constant 0 : index
    %62 = vector.load %arg4[%c0_41, %c3_42, %c0_43, %c0_44] : memref<1x4x8x128xf32, #tpu.memory_space<vmem>>, vector<1x1x8x128xf32>
    %63 = vector.shape_cast %62 : vector<1x1x8x128xf32> to vector<8x128xf32>
    %64 = vector.shape_cast %61 : vector<8x128xf32> to vector<1x1x8x128xf32>
    tpu.vector_store %arg4[%c0_41, %c3_42, %c0_43, %c0_44], %64 {strides = array<i32>} : memref<1x4x8x128xf32, #tpu.memory_space<vmem>>, vector<1x1x8x128xf32>,
    return
  }
  func.func @transform_0(%arg0: i32, %arg1: i32) -> (i32, i32, i32) {
    %c0_i32 = arith.constant 0 : i32
    %c0_i32_0 = arith.constant 0 : i32
    return %arg0, %arg1, %c0_i32 : i32, i32, i32
  }
  func.func @transform_1(%arg0: i32, %arg1: i32) -> (i32, i32, i32) {
    %c0_i32 = arith.constant 0 : i32
    %c0_i32_0 = arith.constant 0 : i32
    return %arg0, %arg1, %c0_i32 : i32, i32, i32
  }
  func.func @transform_2(%arg0: i32, %arg1: i32) -> (i32, i32, i32, i32) {
    %c0_i32 = arith.constant 0 : i32
    %c0_i32_0 = arith.constant 0 : i32
    %c0_i32_1 = arith.constant 0 : i32
    %c0_i32_2 = arith.constant 0 : i32
    return %arg0, %c0_i32, %c0_i32_0, %c0_i32_1 : i32, i32, i32, i32
  }
}

</mosaic_0001>

<bundles_post_ra>
// kernel: tpu_custom_call.1
= control target key start
LH: loop header
LB: loop body
LE: loop exit
PB: predicated region body
PF: predicated region fallthrough
CT: control target
= control target key end

     0   :  { %7 = vsyncpa [#allocation3], 0  ;;  %s923_s0 = inlined_call_operand.hbm [shape: f32[2,32,128], index: 0, kind: input, shape index: {}]   ;;  %s924_s1 = inlined_call_operand.hbm [shape: f32[2,32,128], index: 1, kind: input, shape index: {}]   ;;  %s925_s2 = inlined_call_operand.hbm [shape: f32[2,4,8,128], index: 2, kind: output, shape index: {}]  }
   0x1   :  { %9 = vsyncpa [#allocation3 + $0x1], 0 }
   0x2   :  { %10 = vsyncpa [#allocation6], 0 }
   0x3   :  { %12 = vsyncpa [#allocation6 + $0x1], 0 }
   0x4   :  { %13 = vsyncpa [#allocation4], 0 }
   0x5   :  { %15 = vsyncpa [#allocation4 + $0x1], 0  ;;  %s764_s9 = smov 0   ;;  %s766_s10 = smov 0  }
   0x6   :  { %s768_s11 = smov 0   ;;  %s770_s12 = smov 0  }
   0x7   :  { %s772_s13 = smov 0   ;;  %s774_s14 = smov 0  }
   0x8 LB: > { %s473_s15 = sadd.s32 4294967295, %s743_s14   ;;  %s474_s16 = sadd.s32 4294967294, %s743_s14   ;;  %s743_s14 = sphi %s774_s14, %s21_s14   ;;  %s739_s13 = sphi %s772_s13, %s935_s13   ;;  %s735_s12 = sphi %s770_s12, %s934_s12   ;;  %s731_s11 = sphi %s768_s11, %s933_s11   ;;  %s727_s10 = sphi %s766_s10, %s932_s10   ;;  %s723_s9 = sphi %s764_s9, %s931_s9  }
   0x9   : > { %s33_s17 = sadd.s32 1, %s739_s13  ;;  %s42_s18 = sadd.s32 1, %s731_s11 }
   0xa   : > { %p35_p0 = scmp.ge.s32.totalorder %s33_s17, 2  ;;  %p49_p1 = scmp.ne.s32.totalorder %s731_s11, %s727_s10 }
   0xb   : > { %p50_p2 = scmp.eq.s32.totalorder %s743_s14, 0  ;;  %p55_p3 = scmp.ne.s32.totalorder %s727_s10, %s723_s9 }
   0xc   : > { %s937_s17 = smov (%p35_p0, %s33_s17), 0  ;;  %p56_p5 = scmp.eq.s32.totalorder %s473_s15, 0 }
   0xd   : > { %p805_p4 = por %p50_p2, %p49_p1  ;;  %s37_s20 = ssub.s32 %s739_s13, %s937_s17 }
   0xe   : > { %p107_p6 = scmp.eq.s32.totalorder %s473_s15, 1  ;;  %p40_p7 = scmp.eq.s32.totalorder %s37_s20, 0 }
   0xf   : > { %p811_p8 = por %p56_p5, %p55_p3  ;;  %p113_p10 = scmp.eq.s32.totalorder %s474_s16, 1 }
  0x10   : > { %p815_p9 = por %p107_p6, %p49_p1  ;;  %p476_p12 = scmp.ge.s32.totalorder %s743_s14, 2 }
  0x11   : > { %s820_s23 = scalar_select %p40_p7, %s731_s11, %s42_s18  }
  0x12   : > { %p822_p11 = por %p113_p10, %p55_p3  ;;  %p518_p13 = scmp.lt.s32.totalorder %s743_s14, 2 }
  0x13   : > { %s829_s25 = sand.u32 1, %s731_s11   ;;  %s498_s27 = sshll.u32 %s739_s13, 5 }
  0x14   : > { %s477_s26 = sshll.u32 %s829_s25, 5  ;;  %s144_s30 = scalar_lea.hbm %s923_s0, %s498_s27 }
  0x15   : > { %s137_s3 = scalar_lea.vmem [#allocation2], %s477_s26  ;;  %s145_s5 = sshll.u32 %s144_s30, 4  ;;  %s146_s5 = int_to_ptr.hbm [resolvable:$true] %s145_s5 }
  0x16   : > { %s147_s4 = sshll.u32 %s137_s3, 4  ;;  %p838_p0 = pnand %p518_p13, %p805_p4  ;;  %s148_s4 = int_to_ptr.vmem [resolvable:$true] %s147_s4 }
  0x17   : > { %p483_p1 = scmp.ge.s32.totalorder %s743_s14, 1  ;;  %s134_s7 = scalar_lea.sflag [#allocation3], %s829_s25 }
  0x18   : > { %s745_s8 = smov 128   ;;  %s746_s15 = smov 8  }
  0x19   : > { %510 = dma.hbm_to_vmem [thread:$0]  (!%p838_p0), %s146_s5, 512, %s148_s4, %s134_s7, %s745_s8, %s745_s8, %s746_s15  }
  0x1a   : > { %p179_p2 = scmp.lt.s32.totalorder %s743_s14, 3  ;;  %s168_s20 = scalar_lea.hbm %s924_s1, %s498_s27 }
  0x1b   : > { %s169_s28 = sshll.u32 %s168_s20, 4  ;;  %s161_s19 = scalar_lea.vmem [#allocation5], %s477_s26  ;;  %s170_s28 = int_to_ptr.hbm [resolvable:$true] %s169_s28 }
  0x1c   : > { %p180_p3 = pnand %p483_p1, %p179_p2  ;;  %s171_s29 = sshll.u32 %s161_s19, 4  ;;  %s172_s29 = int_to_ptr.vmem [resolvable:$true] %s171_s29 }
  0x1d   : > { %s158_s30 = scalar_lea.sflag [#allocation6], %s829_s25  ;;  %s854_s3 = sand.u32 (!%p180_p3), 1, %s727_s10  }
  0x1e   : > { %513 = dma.hbm_to_vmem [thread:$0]  (!%p838_p0), %s170_s28, 512, %s172_s29, %s158_s30, %s745_s8, %s745_s8, %s746_s15  }
  0x1f   : > { %183 = sbr.rel (%p180_p3) target bundleno = 91 (0x5b), region = 28  ;;  %s857_s4 = sshll.u32 (!%p180_p3), %s854_s3, 5 }
  0x20   : > { %s186_s27 = scalar_lea.sflag (!%p180_p3), [#allocation3], %s854_s3  ;;  %s189_s5 = scalar_lea.vmem (!%p180_p3), [#allocation2], %s857_s4 }
  0x24   : > { %710 = dma.done.wait (%p811_p8), %s186_s27, 512  }
  0x25   : > { %712 = vsyncadd (%p811_p8), %s186_s27, 4294966784  ;;  %s196_s25 = scalar_lea.sflag [#allocation6], %s854_s3  ;;  %s867_s26 = scalar_lea.vmem [#allocation5], %s857_s4 }
  0x26   : > { %714 = dma.done.wait (%p811_p8), %s196_s25, 512  }
  0x27   : > { %716 = vsyncadd (%p811_p8), %s196_s25, 4294966784  ;;  %v236_v0 = vld [vmem:[%s189_s5] sm:$0xff]  ;;  %v237_v1 = vld [vmem:[%s189_s5 + $0x8] sm:$0xff]  ;;  %s878_s21 = scalar_lea.vmem [#allocation7], %s857_s4  ;;  %s500_s6 = sshll.u32 %s735_s12, 5 }
  0x28   : > { %v238_v2 = vld [vmem:[%s189_s5 + $0x10] sm:$0xff]  ;;  %v239_v3 = vld [vmem:[%s189_s5 + $0x18] sm:$0xff]  ;;  %573 = vlog2.f32 %v236_v0  ;;  %v256_v4 = vsub.f32 1.0, %v236_v0  ;;  %v257_v5 = vsub.f32 1.0, %v237_v1  ;;  %v240_v9 = vld [vmem:[%s867_s26] sm:$0xff]  ;;  %v324_v26 = vadd.f32 %v237_v1, %v236_v0  ;;  %s359_s15 = scalar_lea.hbm %s925_s2, %s500_s6  ;;  %s360_s16 = sshll.u32 %s878_s21, 4  ;;  %s361_s16 = int_to_ptr.vmem [resolvable:$true] %s360_s16 }
  0x29   : > { %575 = vlog2.f32 %v237_v1  ;;  %v258_v6 = vsub.f32 1.0, %v238_v2  ;;  %v259_v7 = vsub.f32 1.0, %v239_v3  ;;  %v241_v10 = vld [vmem:[%s867_s26 + $0x8] sm:$0xff]  ;;  %v312_v13 = vmul.f32 %v240_v9, %v236_v0  ;;  %v242_v16 = vld [vmem:[%s867_s26 + $0x10] sm:$0xff]  ;;  %v243_v23 = vld [vmem:[%s867_s26 + $0x18] sm:$0xff]  ;;  %s362_s18 = sshll.u32 %s359_s15, 4  ;;  %s363_s18 = int_to_ptr.hbm [resolvable:$true] %s362_s18 }
  0x2a   : > { %577 = vlog2.f32 %v238_v2  ;;  %v313_v14 = vmul.f32 %v241_v10, %v237_v1  ;;  %v314_v20 = vmul.f32 %v242_v16, %v238_v2  ;;  %v328_v27 = vadd.f32 %v241_v10, %v240_v9  ;;  %s348_s20 = scalar_lea.sflag [#allocation4], %s854_s3  ;;  %s671_s28 = sshra.s32 %s363_s18, 4  ;;  %s672_s28 = int_to_ptr.hbm [resolvable:$true] %s671_s28 }
  0x2b   : > { %579 = vlog2.f32 %v239_v3  ;;  %v315_v31 = vmul.f32 %v243_v23, %v239_v3  ;;  %v325_v36 = vadd.f32 %v324_v26, %v238_v2  ;;  %s673_s12 = scalar_lea.hbm %s672_s28, 32  ;;  %s677_s30 = scalar_lea.hbm %s925_s2, 64 }
  0x2c   : > { %581 = vlog2.f32 %v256_v4  ;;  %v320_v21 = vadd.f32 %v313_v14, %v312_v13  ;;  %v329_v37 = vadd.f32 %v328_v27, %v242_v16  ;;  %p674_p4 = scmp.ne.s32.totalorder %s672_s28, %s673_s12  ;;  %p678_p7 = scmp.lt.s32.totalorder %s672_s28, %s925_s2 }
  0x2d   : > { %583 = vlog2.f32 %v257_v5  ;;  %v326_v45 = vadd.f32 %v325_v36, %v239_v3  ;;  %p679_p8 = scmp.lt.s32.totalorder %s677_s30, %s673_s12 }
  0x2e   : > { %v574_v8 = vpop.eup %573  ;;  %585 = vlog2.f32 %v258_v6  ;;  %v321_v32 = vadd.f32 %v320_v21, %v314_v20  ;;  %v330_v46 = vadd.f32 %v329_v37, %v243_v23  ;;  %p675_p5 = pnand %p674_p4, %p815_p9 }
  0x2f   : > { %v576_v11 = vpop.eup %575  ;;  %v245_v12 = vmul.f32 0.6931472, %v574_v8  ;;  %587 = vlog2.f32 %v259_v7  ;;  %490 = vst [vmem:[%s878_s21 + $0x10] sm:$0xff] %v326_v45  ;;  %p680_p10 = por %p679_p8, %p678_p7 }
  0x30   : > { %v578_v15 = vpop.eup %577  ;;  %v247_v17 = vmul.f32 0.6931472, %v576_v11  ;;  %v322_v42 = vadd.f32 %v321_v32, %v315_v31  ;;  %492 = vst [vmem:[%s878_s21 + $0x18] sm:$0xff] %v330_v46  ;;  %p676_p6 = pneg %p675_p5 }
  0x31   : > { %v580_v18 = vpop.eup %579  ;;  %v249_v19 = vmul.f32 0.6931472, %v578_v15  ;;  %v252_v25 = vmax.f32 %v245_v12, -100.0 }
  0x32   : > { %v582_v22 = vpop.eup %581  ;;  %v251_v24 = vmul.f32 0.6931472, %v580_v18  ;;  %v253_v29 = vmax.f32 %v247_v17, -100.0  ;;  %488 = vst [vmem:[%s878_s21 + $0x8] sm:$0xff] %v322_v42  ;;  %p681_p13 = pnand %p680_p10, %p676_p6 }
  0x33   : > { %v584_v28 = vpop.eup %583  ;;  %v261_v30 = vmul.f32 0.6931472, %v582_v22  ;;  %v254_v34 = vmax.f32 %v249_v19, -100.0 }
  0x34   : > { %v586_v33 = vpop.eup %585  ;;  %v263_v35 = vmul.f32 0.6931472, %v584_v28  ;;  %v255_v39 = vmax.f32 %v251_v24, -100.0 }
  0x35   : > { %v588_v38 = vpop.eup %587  ;;  %v265_v40 = vmul.f32 0.6931472, %v586_v33  ;;  %v268_v41 = vmax.f32 %v261_v30, -100.0 }
  0x36   : > { %v267_v43 = vmul.f32 0.6931472, %v588_v38  ;;  %v269_v44 = vmax.f32 %v263_v35, -100.0 }
  0x37   : > { %v270_v47 = vmax.f32 %v265_v40, -100.0  ;;  %v272_v48 = vsub.f32 %v252_v25, %v268_v41 }
  0x38   : > { %v271_v49 = vmax.f32 %v267_v43, -100.0  ;;  %v273_v50 = vsub.f32 %v253_v29, %v269_v44 }
  0x39   : > { %v274_v51 = vsub.f32 %v254_v34, %v270_v47  ;;  %v276_v52 = vmul.f32 %v272_v48, %v240_v9 }
  0x3a   : > { %v275_v53 = vsub.f32 %v255_v39, %v271_v49  ;;  %v277_v54 = vmul.f32 %v273_v50, %v241_v10 }
  0x3b   : > { %v278_v55 = vmul.f32 %v274_v51, %v242_v16  ;;  %v280_v56 = vadd.f32 %v276_v52, %v268_v41 }
  0x3c   : > { %v279_v57 = vmul.f32 %v275_v53, %v243_v23  ;;  %v281_v58 = vadd.f32 %v277_v54, %v269_v44 }
  0x3d   : > { %v282_v59 = vadd.f32 %v278_v55, %v270_v47  ;;  %v284_v60 = vsub.f32 0.0, %v280_v56 }
  0x3e   : > { %v283_v61 = vadd.f32 %v279_v57, %v271_v49  ;;  %v285_v62 = vsub.f32 0.0, %v281_v58 }
  0x3f   : > { %v286_v63 = vsub.f32 0.0, %v282_v59  ;;  %v288_v0 = vsub.f32 0.0, %v284_v60 }
  0x40   : > { %v287_v1 = vsub.f32 0.0, %v283_v61  ;;  %v289_v2 = vsub.f32 0.0, %v285_v62 }
  0x41   : > { %v290_v3 = vsub.f32 0.0, %v286_v63  ;;  %v292_v4 = vmul.f32 1.442695, %v288_v0 }
  0x42   : > { %v291_v5 = vsub.f32 0.0, %v287_v1  ;;  %v294_v6 = vmul.f32 1.442695, %v289_v2 }
  0x43   : > { %589 = vpow2.f32 %v292_v4  ;;  %v296_v7 = vmul.f32 1.442695, %v290_v3 }
  0x44   : > { %591 = vpow2.f32 %v294_v6  ;;  %v298_v8 = vmul.f32 1.442695, %v291_v5 }
  0x45   : > { %593 = vpow2.f32 %v296_v7 }
  0x46   : > { %595 = vpow2.f32 %v298_v8 }
  0x49   : > { %v590_v9 = vpop.eup %589 }
  0x4a   : > { %v592_v10 = vpop.eup %591  ;;  %v300_v11 = vsub.f32 1.0, %v590_v9 }
  0x4b   : > { %v594_v12 = vpop.eup %593  ;;  %v301_v13 = vsub.f32 1.0, %v592_v10 }
  0x4c   : > { %v596_v14 = vpop.eup %595  ;;  %v302_v15 = vsub.f32 1.0, %v594_v12  ;;  %v304_v16 = vmul.f32 %v300_v11, %v300_v11 }
  0x4d   : > { %v303_v17 = vsub.f32 1.0, %v596_v14  ;;  %v305_v18 = vmul.f32 %v301_v13, %v301_v13 }
  0x4e   : > { %v306_v19 = vmul.f32 %v302_v15, %v302_v15  ;;  %v308_v20 = vmul.f32 %v304_v16, %v284_v60 }
  0x4f   : > { %v307_v21 = vmul.f32 %v303_v17, %v303_v17  ;;  %v309_v22 = vmul.f32 %v305_v18, %v285_v62 }
  0x50   : > { %v310_v23 = vmul.f32 %v306_v19, %v286_v63 }
  0x51   : > { %v311_v24 = vmul.f32 %v307_v21, %v287_v1  ;;  %v316_v25 = vadd.f32 %v309_v22, %v308_v20 }
  0x53   : > { %v317_v26 = vadd.f32 %v316_v25, %v310_v23 }
  0x55   : > { %v318_v27 = vadd.f32 %v317_v26, %v311_v24 }
  0x57   : > { %334 = vst [vmem:[%s878_s21] sm:$0xff] %v318_v27 }
  0x58   : > { %684 = shalt.err (!%p681_p13)
}
  0x59   : > { %s747_s3 = smov 128   ;;  %s748_s5 = smov 8  }
  0x5a   : > { %505 = dma.vmem_to_hbm [thread:$0]  (%p815_p9), %s361_s16, 512, %s363_s18, %s348_s20, %s747_s3, %s747_s3, %s748_s5  }
  0x5b PF: > { %s377_s25 = sand.u32 1, %s723_s9   ;;  %p515_p0 = pnand %p476_p12, %p822_p11 }
  0x5c   : > { %s378_s26 = scalar_lea.sflag [#allocation4], %s377_s25 }
  0x5d   : > { %p516_p1 = pneg %p515_p0 }
  0x5f   : > { %718 = dma.done.wait (%p516_p1), %s378_s26, 512  }
  0x60   : > { %720 = vsyncadd (%p516_p1), %s378_s26, 4294966784  ;;  %s21_s14 = sadd.s32 1, %s743_s14   ;;  %s931_s9 = smov %s727_s10 }
  0x61   : > { %p18_p2 = scmp.ge.s32.totalorder %s21_s14, 4   ;;  %s932_s10 = smov %s731_s11 }
  0x62   : > { %s933_s11 = smov %s820_s23  ;;  %s934_s12 = smov %s739_s13 }
  0x63   : > { %s935_s13 = smov %s937_s17  ;;  %20 = sbr.rel (!%p18_p2) target bundleno = 8 (0x8), region = 93 }
  0x68   :  { %384 = vsyncpa [#allocation3], 1 }
  0x69   :  { %386 = vsyncpa [#allocation3 + $0x1], 1 }
  0x6a   :  { %387 = vsyncpa [#allocation6], 1 }
  0x6b   :  { %389 = vsyncpa [#allocation6 + $0x1], 1 }
  0x6c   :  { %390 = vsyncpa [#allocation4], 1 }
  0x6d   :  { %392 = vsyncpa [#allocation4 + $0x1], 1 }

</bundles_post_ra>
